<compile_context>
chip_gen: v5e
topology: v5e:2x2
jax: 0.10.0
libtpu: 0.0.40
codegen_flags: <defaults>
</compile_context>

<pallas_src>
import functools
import math

import jax
import jax.numpy as jnp
from jax.experimental import pallas as pl
from jax.experimental.pallas import tpu as pltpu


def _round_up(x, m):
    return (x + m - 1) // m * m


def _classifier_kernel(x_ref, w_ref, b_ref, o_ref, *,
                       tile_m, tile_ext, cout_pad, tap_offsets):
    """Grid step (n, t): batch element n, row tile t.

    x_ref: (1, Cin_pad, Lext)        bf16, zero-padded image flattened at width
                                     Wp (+ flat sentinel zeros), resident across
                                     the tile axis (constant block index).
    w_ref: (NT*Cout_pad, Cin_pad)    bf16, tap-folded 1x1 weights (NT = NB*9).
    b_ref: (Cout_pad, 1)             f32, summed branch biases.
    o_ref: (1, Cout_pad, tile_m)     f32, lane-dense flattened output tile.
    """
    t = pl.program_id(1)
    base = pl.multiple_of(t * tile_m, 128)

    # One wide MXU contraction per tile ("shifted 1x1 conv"): output rows fold
    # all branches/taps/classes, contraction over channels, lanes = tile + halo.
    x_slab = x_ref[0, :, pl.ds(base, tile_ext)]                # (Cin_pad, tile_ext) bf16
    slab = jnp.dot(w_ref[...], x_slab,
                   preferred_element_type=jnp.float32)         # (NT*Cout_pad, tile_ext) f32

    # Epilogue on the VPU: sum the statically shifted per-tap slabs, add bias.
    off0 = tap_offsets[0]
    acc = slab[0:cout_pad, off0:off0 + tile_m]
    for i, off in enumerate(tap_offsets[1:], start=1):
        acc = acc + slab[i * cout_pad:(i + 1) * cout_pad, off:off + tile_m]
    acc = acc + b_ref[...]
    o_ref[0, :, :] = acc.astype(o_ref.dtype)


def classifier_module_pallas(x_nchw, weights, biases, dilations, paddings,
                             *, tile_rows=8):
    """x_nchw: (N, Cin, H, W) f32; weights: (NB, Cout, Cin, 3, 3) torch OIHW per
    branch; biases: (NB, Cout).  Returns (N, Cout, H, W), matching the PyTorch
    module (requires padding_i == dilation_i, the usual DeepLab setting)."""
    N, Cin, H, W = x_nchw.shape
    NB, Cout = weights.shape[0], weights.shape[1]
    assert weights.shape == (NB, Cout, Cin, 3, 3)
    assert all(p == d for p, d in zip(paddings, dilations)), (
        "output-shape preservation assumes padding == dilation per branch")

    mp = max(paddings)
    TH = tile_rows
    Ht = _round_up(H, TH)                 # pad rows instead of TH=H fallback
    n_tiles = Ht // TH
    lane_q = 128 // math.gcd(TH, 128)     # makes tile_m a multiple of 128
    Wp = _round_up(W + 2 * mp, lane_q)
    Hp = Ht + 2 * mp
    tile_m = TH * Wp
    Cin_pad = _round_up(Cin, 16)          # bf16 sublane packing
    Cout_pad = _round_up(Cout, 8)
    n_taps = NB * 9
    max_off = 2 * mp * Wp + 2 * mp
    halo_pad = _round_up(max_off, 128)
    tile_ext = tile_m + halo_pad          # tile + read halo (lane aligned)
    Lext = Ht * Wp + halo_pad             # covers mp + Hp*Wp, multiple of 128

    # Glue: zero-pad channels/rows/cols (stays NCHW, no transpose), flatten rows
    # at width Wp, add mp flat sentinel zeros in front, cast to bf16.
    # TODO(synk): at production shapes do the spatial zero-pad in VMEM instead
    # of materializing the inflated padded activation in HBM.
    x_p = jnp.pad(x_nchw, ((0, 0), (0, Cin_pad - Cin),
                           (mp, mp + Ht - H), (mp, Wp - W - mp)))
    x_flat = x_p.reshape(N, Cin_pad, Hp * Wp)
    x_ext = jnp.pad(x_flat, ((0, 0), (0, 0), (mp, Lext - Hp * Wp - mp)))
    x_ext = x_ext.astype(jnp.bfloat16)

    # Glue: tap-folded weight packing (NT*Cout_pad, Cin_pad), tap-major
    # (branch, ky, kx), class-minor; branch biases summed once.
    w_t = jnp.transpose(weights, (0, 3, 4, 1, 2))            # (NB,3,3,Cout,Cin)
    w_t = jnp.pad(w_t, ((0, 0), (0, 0), (0, 0),
                        (0, Cout_pad - Cout), (0, Cin_pad - Cin)))
    w_fold = w_t.reshape(n_taps * Cout_pad, Cin_pad).astype(jnp.bfloat16)
    bias_col = jnp.pad(jnp.sum(biases, axis=0), (0, Cout_pad - Cout))
    bias_col = bias_col.reshape(Cout_pad, 1).astype(jnp.float32)

    # Static 1-D shift per tap: with the padded image flattened row-major at
    # width Wp, tap (ky,kx) of the branch with dilation d reads flat index
    # jf + mp + (mp + (ky-1)*d)*Wp + (kx-1)*d for output flat index jf.  Column
    # wrap-around only pollutes padding columns, which the wrapper discards.
    tap_offsets = []
    for d in dilations:
        for ky in range(3):
            for kx in range(3):
                tap_offsets.append(mp + (mp + (ky - 1) * d) * Wp + (kx - 1) * d)
    tap_offsets = tuple(tap_offsets)

    kernel = functools.partial(_classifier_kernel, tile_m=tile_m,
                               tile_ext=tile_ext, cout_pad=Cout_pad,
                               tap_offsets=tap_offsets)

    # VMEM budget from actual block sizes (double-buffered blocks + big temps).
    xb = Cin_pad * Lext * 2
    wb = n_taps * Cout_pad * Cin_pad * 2
    bb = Cout_pad * 4
    ob = Cout_pad * tile_m * 4
    slab_b = n_taps * Cout_pad * tile_ext * 4
    vmem_need = 2 * (xb + wb + bb + ob) + slab_b + 2 * ob
    vmem_limit = int(min(max(vmem_need + (8 << 20), 32 << 20), 100 << 20))

    flops = 2 * N * H * W * NB * 9 * Cin * Cout
    bytes_accessed = (x_ext.size * 2 + w_fold.size * 2 + bias_col.size * 4
                      + N * Cout_pad * Ht * Wp * 4)

    out_flat = pl.pallas_call(
        kernel,
        out_shape=jax.ShapeDtypeStruct((N, Cout_pad, Ht * Wp), jnp.float32),
        grid_spec=pltpu.PrefetchScalarGridSpec(
            num_scalar_prefetch=0,
            grid=(N, n_tiles),
            in_specs=[
                pl.BlockSpec((1, Cin_pad, Lext), lambda n, t: (n, 0, 0)),
                pl.BlockSpec((n_taps * Cout_pad, Cin_pad), lambda n, t: (0, 0)),
                pl.BlockSpec((Cout_pad, 1), lambda n, t: (0, 0)),
            ],
            out_specs=pl.BlockSpec((1, Cout_pad, tile_m), lambda n, t: (n, 0, t)),
        ),
        compiler_params=pltpu.CompilerParams(
            dimension_semantics=("parallel", "parallel"),
            vmem_limit_bytes=vmem_limit),
        cost_estimate=pl.CostEstimate(flops=flops, transcendentals=0,
                                      bytes_accessed=bytes_accessed),
    )(x_ext, w_fold, bias_col)

    # Glue: lane-dense flat output -> NCHW (reshape + slice, no transpose).
    return out_flat.reshape(N, Cout_pad, Ht, Wp)[:, :Cout, :H, mp:mp + W]


def _reference(x_nchw, weights, biases, dilations, paddings):
    """Pure-JAX reference using lax.conv_general_dilated (matches torch)."""
    out = None
    for b, (d, p) in enumerate(zip(dilations, paddings)):
        y = jax.lax.conv_general_dilated(
            x_nchw, weights[b],
            window_strides=(1, 1),
            padding=((p, p), (p, p)),
            rhs_dilation=(d, d),
            dimension_numbers=("NCHW", "OIHW", "NCHW"),
            preferred_element_type=jnp.float32)
        y = y + biases[b][None, :, None, None]
        out = y if out is None else out + y
    return out


def _run_case(key, N, Cin, H, W, num_classes, dilations, paddings):
    kx, kw, kb = jax.random.split(key, 3)
    NB = len(dilations)
    x = jax.random.normal(kx, (N, Cin, H, W), dtype=jnp.float32)
    # m.weight.data.normal_(0, 0.01); bias: small deterministic init.
    weights = 0.01 * jax.random.normal(kw, (NB, num_classes, Cin, 3, 3),
                                       dtype=jnp.float32)
    biases = 0.1 * jax.random.normal(kb, (NB, num_classes), dtype=jnp.float32)

    out = classifier_module_pallas(x, weights, biases, dilations, paddings)
    out = jax.block_until_ready(out)
    assert out.shape == (N, num_classes, H, W), out.shape

    # Kernel computes with bf16 inputs / f32 accumulation: compare against the
    # f32 reference evaluated on the same bf16-rounded inputs.
    x_b = x.astype(jnp.bfloat16).astype(jnp.float32)
    w_b = weights.astype(jnp.bfloat16).astype(jnp.float32)
    ref = _reference(x_b, w_b, biases, dilations, paddings)
    err = float(jnp.max(jnp.abs(out - ref)))
    assert err < 1e-3, err
    return err


if __name__ == "__main__":
    master = jax.random.PRNGKey(0)
    k1, k2 = jax.random.split(master)

    # Small config consistent with the module's __init__.
    _run_case(k1, N=2, Cin=4, H=16, W=16, num_classes=8,
              dilations=[1, 2], paddings=[1, 2])
    # Odd shapes exercise the row / channel / class padding guards.
    _run_case(k2, N=1, Cin=5, H=10, W=13, num_classes=6,
              dilations=[1, 2, 3], paddings=[1, 2, 3])

    print("KERNEL_OK")
</pallas_src>

<mosaic_0001>
module attributes {stable_mosaic.version = 11 : i64} {
  func.func @_classifier_kernel(%arg0: i32, %arg1: i32, %arg2: memref<1x16x768xbf16, #tpu.memory_space<vmem>>, %arg3: memref<144x16xbf16, #tpu.memory_space<vmem>>, %arg4: memref<8x1xf32, #tpu.memory_space<vmem>>, %arg5: memref<1x8x256xf32, #tpu.memory_space<vmem>>) attributes {dimension_semantics = [#tpu.dimension_semantics<parallel>, #tpu.dimension_semantics<parallel>], iteration_bounds = array<i64: 2, 2>, scalar_prefetch = 0 : i64, scratch_operands = 0 : i64, tpu.core_type = #tpu.core_type<tc>, window_params = [{transform_indices = @transform_0, window_bounds = array<i64: 1, 16, 768>}, {pipeline_mode = #tpu.pipeline_mode<synchronous>, transform_indices = @transform_1, window_bounds = array<i64: 144, 16>}, {pipeline_mode = #tpu.pipeline_mode<synchronous>, transform_indices = @transform_2, window_bounds = array<i64: 8, 1>}, {transform_indices = @transform_3, window_bounds = array<i64: 1, 8, 256>}]} {
    %c256_i32 = arith.constant 256 : i32
    %0 = arith.muli %arg1, %c256_i32 : i32
    %1 = tpu.assume_multiple %0, 128 : i32
    %c0 = arith.constant 0 : index
    %c0_0 = arith.constant 0 : index
    %2 = arith.index_cast %1 : i32 to index
    %3 = vector.load %arg2[%c0, %c0_0, %2] : memref<1x16x768xbf16, #tpu.memory_space<vmem>>, vector<1x16x512xbf16>
    %4 = vector.shape_cast %3 : vector<1x16x512xbf16> to vector<16x512xbf16>
    %c0_1 = arith.constant 0 : index
    %c0_2 = arith.constant 0 : index
    %5 = vector.load %arg3[%c0_1, %c0_2] : memref<144x16xbf16, #tpu.memory_space<vmem>>, vector<144x16xbf16>
    %cst = arith.constant dense<0.000000e+00> : vector<144x512xf32>
    %6 = tpu.matmul %5, %4, %cst {dimension_numbers = #tpu.dot_dimension_numbers<[1], [0], [0], [1], [0, 0, 1, 1], [], []>} : vector<144x16xbf16>, vector<16x512xbf16>, vector<144x512xf32> -> vector<144x512xf32>
    %7 = vector.extract_strided_slice %6 {offsets = [0, 33], sizes = [8, 256], strides = [1, 1]} : vector<144x512xf32> to vector<8x256xf32>
    %8 = vector.extract_strided_slice %6 {offsets = [8, 34], sizes = [8, 256], strides = [1, 1]} : vector<144x512xf32> to vector<8x256xf32>
    %9 = arith.addf %7, %8 : vector<8x256xf32>
    %10 = vector.extract_strided_slice %6 {offsets = [16, 35], sizes = [8, 256], strides = [1, 1]} : vector<144x512xf32> to vector<8x256xf32>
    %11 = arith.addf %9, %10 : vector<8x256xf32>
    %12 = vector.extract_strided_slice %6 {offsets = [24, 65], sizes = [8, 256], strides = [1, 1]} : vector<144x512xf32> to vector<8x256xf32>
    %13 = arith.addf %11, %12 : vector<8x256xf32>
    %14 = vector.extract_strided_slice %6 {offsets = [32, 66], sizes = [8, 256], strides = [1, 1]} : vector<144x512xf32> to vector<8x256xf32>
    %15 = arith.addf %13, %14 : vector<8x256xf32>
    %16 = vector.extract_strided_slice %6 {offsets = [40, 67], sizes = [8, 256], strides = [1, 1]} : vector<144x512xf32> to vector<8x256xf32>
    %17 = arith.addf %15, %16 : vector<8x256xf32>
    %18 = vector.extract_strided_slice %6 {offsets = [48, 97], sizes = [8, 256], strides = [1, 1]} : vector<144x512xf32> to vector<8x256xf32>
    %19 = arith.addf %17, %18 : vector<8x256xf32>
    %20 = vector.extract_strided_slice %6 {offsets = [56, 98], sizes = [8, 256], strides = [1, 1]} : vector<144x512xf32> to vector<8x256xf32>
    %21 = arith.addf %19, %20 : vector<8x256xf32>
    %22 = vector.extract_strided_slice %6 {offsets = [64, 99], sizes = [8, 256], strides = [1, 1]} : vector<144x512xf32> to vector<8x256xf32>
    %23 = arith.addf %21, %22 : vector<8x256xf32>
    %24 = vector.extract_strided_slice %6 {offsets = [72, 0], sizes = [8, 256], strides = [1, 1]} : vector<144x512xf32> to vector<8x256xf32>
    %25 = arith.addf %23, %24 : vector<8x256xf32>
    %26 = vector.extract_strided_slice %6 {offsets = [80, 2], sizes = [8, 256], strides = [1, 1]} : vector<144x512xf32> to vector<8x256xf32>
    %27 = arith.addf %25, %26 : vector<8x256xf32>
    %28 = vector.extract_strided_slice %6 {offsets = [88, 4], sizes = [8, 256], strides = [1, 1]} : vector<144x512xf32> to vector<8x256xf32>
    %29 = arith.addf %27, %28 : vector<8x256xf32>
    %30 = vector.extract_strided_slice %6 {offsets = [96, 64], sizes = [8, 256], strides = [1, 1]} : vector<144x512xf32> to vector<8x256xf32>
    %31 = arith.addf %29, %30 : vector<8x256xf32>
    %32 = vector.extract_strided_slice %6 {offsets = [104, 66], sizes = [8, 256], strides = [1, 1]} : vector<144x512xf32> to vector<8x256xf32>
    %33 = arith.addf %31, %32 : vector<8x256xf32>
    %34 = vector.extract_strided_slice %6 {offsets = [112, 68], sizes = [8, 256], strides = [1, 1]} : vector<144x512xf32> to vector<8x256xf32>
    %35 = arith.addf %33, %34 : vector<8x256xf32>
    %36 = vector.extract_strided_slice %6 {offsets = [120, 128], sizes = [8, 256], strides = [1, 1]} : vector<144x512xf32> to vector<8x256xf32>
    %37 = arith.addf %35, %36 : vector<8x256xf32>
    %38 = vector.extract_strided_slice %6 {offsets = [128, 130], sizes = [8, 256], strides = [1, 1]} : vector<144x512xf32> to vector<8x256xf32>
    %39 = arith.addf %37, %38 : vector<8x256xf32>
    %40 = vector.extract_strided_slice %6 {offsets = [136, 132], sizes = [8, 256], strides = [1, 1]} : vector<144x512xf32> to vector<8x256xf32>
    %41 = arith.addf %39, %40 : vector<8x256xf32>
    %c0_3 = arith.constant 0 : index
    %c0_4 = arith.constant 0 : index
    %42 = vector.load %arg4[%c0_3, %c0_4] : memref<8x1xf32, #tpu.memory_space<vmem>>, vector<8x1xf32>
    %43 = vector.broadcast %42 : vector<8x1xf32> to vector<8x256xf32>
    %44 = arith.addf %41, %43 : vector<8x256xf32>
    %c0_5 = arith.constant 0 : index
    %c0_6 = arith.constant 0 : index
    %c0_7 = arith.constant 0 : index
    %45 = vector.load %arg5[%c0_5, %c0_6, %c0_7] : memref<1x8x256xf32, #tpu.memory_space<vmem>>, vector<1x8x256xf32>
    %46 = vector.shape_cast %45 : vector<1x8x256xf32> to vector<8x256xf32>
    %47 = vector.shape_cast %44 : vector<8x256xf32> to vector<1x8x256xf32>
    tpu.vector_store %arg5[%c0_5, %c0_6, %c0_7], %47 {strides = array<i32>} : memref<1x8x256xf32, #tpu.memory_space<vmem>>, vector<1x8x256xf32>,
    return
  }
  func.func @transform_0(%arg0: i32, %arg1: i32) -> (i32, i32, i32) {
    %c0_i32 = arith.constant 0 : i32
    %c0_i32_0 = arith.constant 0 : i32
    %c0_i32_1 = arith.constant 0 : i32
    return %arg0, %c0_i32, %c0_i32_0 : i32, i32, i32
  }
  func.func @transform_1(%arg0: i32, %arg1: i32) -> (i32, i32) {
    %c0_i32 = arith.constant 0 : i32
    %c0_i32_0 = arith.constant 0 : i32
    %c0_i32_1 = arith.constant 0 : i32
    return %c0_i32, %c0_i32_0 : i32, i32
  }
  func.func @transform_2(%arg0: i32, %arg1: i32) -> (i32, i32) {
    %c0_i32 = arith.constant 0 : i32
    %c0_i32_0 = arith.constant 0 : i32
    %c0_i32_1 = arith.constant 0 : i32
    return %c0_i32, %c0_i32_0 : i32, i32
  }
  func.func @transform_3(%arg0: i32, %arg1: i32) -> (i32, i32, i32) {
    %c0_i32 = arith.constant 0 : i32
    %c0_i32_0 = arith.constant 0 : i32
    return %arg0, %c0_i32, %arg1 : i32, i32, i32
  }
}

</mosaic_0001>

<bundles_post_ra>
// kernel: tpu_custom_call.1
= control target key start
LH: loop header
LB: loop body
LE: loop exit
PB: predicated region body
PF: predicated region fallthrough
CT: control target
= control target key end

     0   :  { %8 = vsyncpa [#allocation3], 0  ;;  %s1491_s0 = inlined_call_operand.vmem [shape: bf16[2,16,768], index: 0, kind: input, shape index: {}]   ;;  %s1492_s1 = inlined_call_operand.vmem [shape: bf16[144,16], index: 1, kind: input, shape index: {}]   ;;  %s1493_s2 = inlined_call_operand.vmem [shape: f32[8,1], index: 2, kind: input, shape index: {}]   ;;  %s1494_s3 = inlined_call_operand.hbm [shape: f32[2,8,512], index: 3, kind: output, shape index: {}]  }
   0x1   :  { %10 = vsyncpa [#allocation3 + $0x1], 0  ;;  %s1247_s12 = smov 0   ;;  %s1249_s13 = smov 0  }
   0x2   :  { %s1251_s14 = smov 0   ;;  %s1253_s15 = smov 0  }
   0x3   :  { %s1255_s16 = smov 0   ;;  %s1257_s17 = smov 0  }
   0x4   :  { %s1259_s18 = smov 0   ;;  %s1261_s19 = smov 0  }
   0x5 LB: > { %s913_s20 = sadd.s32 4294967295, %s1211_s19   ;;  %s914_s21 = sadd.s32 4294967294, %s1211_s19   ;;  %s1211_s19 = sphi %s1261_s19, %s16_s19   ;;  %s1207_s18 = sphi %s1259_s18, %s1503_s18   ;;  %s1203_s17 = sphi %s1257_s17, %s1502_s17   ;;  %s1199_s16 = sphi %s1255_s16, %s1501_s16   ;;  %s1195_s15 = sphi %s1253_s15, %s1500_s15   ;;  %s1191_s14 = sphi %s1251_s14, %s1499_s14   ;;  %s1187_s13 = sphi %s1249_s13, %s1498_s13   ;;  %s1183_s12 = sphi %s1247_s12, %s1497_s12  }
   0x6   : > { %s25_s22 = sadd.s32 1, %s1203_s17  ;;  %s28_s23 = sadd.s32 1, %s1207_s18 }
   0x7   : > { %p26_p0 = scmp.ge.s32.totalorder %s25_s22, 2  ;;  %p115_p1 = scmp.ne.s32.totalorder %s1191_s14, %s1187_s13 }
   0x8   : > { %p116_p2 = scmp.eq.s32.totalorder %s913_s20, 3  ;;  %p121_p5 = scmp.ne.s32.totalorder %s1187_s13, %s1183_s12 }
   0x9   : > { %s1505_s22 = smov (%p26_p0, %s25_s22), 0  ;;  %s1507_s23 = smov (!%p26_p0, %s28_s23), %s1207_s18 }
   0xa   : > { %s101_s24 = ssub.s32 %s1203_s17, %s1505_s22  ;;  %p1298_p3 = por %p116_p2, %p115_p1 }
   0xb   : > { %p30_p4 = scmp.ge.s32.totalorder %s1507_s23, 2  ;;  %p122_p6 = scmp.eq.s32.totalorder %s914_s21, 3 }
   0xc   : > { %p917_p7 = scmp.ge.s32.totalorder %s1211_s19, 1  ;;  %p154_p9 = scmp.lt.s32.totalorder %s1211_s19, 5 }
   0xd   : > { %s1509_s23 = smov (%p30_p4, %s1507_s23), 0  ;;  %p1307_p8 = por %p122_p6, %p121_p5 }
   0xe   : > { %s100_s27 = ssub.s32 %s1207_s18, %s1509_s23  ;;  %s105_s28 = sadd.s32 1, %s1191_s14 }
   0xf   : > { %s102_s29 = sor.u32 %s101_s24, %s100_s27  ;;  %p155_p10 = pnand %p917_p7, %p154_p9 }
  0x10   : > { %p103_p11 = scmp.eq.s32.totalorder %s102_s29, 0  ;;  %p178_p12 = scmp.lt.s32.totalorder (!%p155_p10), %s1199_s16, 1 }
  0x11   : > { %158 = sbr.rel (%p155_p10) target bundleno = 543 (0x21f), region = 32  ;;  %s920_s4 = sshll.u32 (!%p155_p10), %s1195_s15, 8 }
  0x12   : > { %s1316_s30 = scalar_select %p103_p11, %s1191_s14, %s105_s28  }
  0x13   : > { %s186_s5 = sshra.s32 (!%p155_p10), %s920_s4, 7  ;;  %s1213_s29 = smov (!%p155_p10), 127  }
  0x14   : > { %s921_s8 = sshll.u32 (!%p155_p10), %s186_s5, 2  ;;  %s1214_s4 = smov (!%p155_p10), 126  }
  0x15   : > { %s1215_s5 = smov (!%p155_p10), 96   ;;  %s1219_s9 = smov (!%p155_p10), 63  }
  0x16   : > { %s179_s6 = scalar_select %p178_p12, %s1199_s16, 1  ;;  %v1020_v11 = vld [vmem:[%s1492_s1] sm:$0xff]  ;;  %vm277_vm0 = vcmask 130048   ;;  %v1021_v13 = vld [vmem:[%s1492_s1 + $0x8] sm:$0xff]  ;;  %v1022_v14 = vld [vmem:[%s1492_s1 + $0x10] sm:$0xff]  ;;  %vm528_vm1 = vcmask 1031168  }
  0x17   : > { %v1023_v15 = vld [vmem:[%s1492_s1 + $0x18] sm:$0xff]  ;;  %v1024_v16 = vld [vmem:[%s1492_s1 + $0x20] sm:$0xff]  ;;  %v1025_v17 = vld [vmem:[%s1492_s1 + $0x28] sm:$0xff]  ;;  %s1220_s10 = smov 62   ;;  %s1223_s21 = smov 29   ;;  %vm510_vm2 = vcmask 1039360  }
  0x18   : > { %s1029_s7 = smul.u32 48, %s179_s6  ;;  %v1026_v18 = vld [vmem:[%s1492_s1 + $0x30] sm:$0xff]  ;;  %v1027_v19 = vld [vmem:[%s1492_s1 + $0x38] sm:$0xff]  ;;  %v1028_v21 = vld [vmem:[%s1492_s1 + $0x40] sm:$0xff]  ;;  %s1216_s6 = smov 95   ;;  %vm546_vm3 = vcmask 785408  }
  0x19   : > { %s1224_s24 = smov 97   ;;  %s1225_s27 = smov 93   ;;  %vm564_vm4 = vcmask 777216   ;;  %vm582_vm5 = vcmask 769024   ;;  %vm600_vm6 = vcmask 523264   ;;  %vm618_vm7 = vcmask 515072  }
  0x1a   : > { %s182_s11 = scalar_lea.vmem %s1491_s0, %s1029_s7  ;;  %s1217_s7 = smov 94   ;;  %vm636_vm8 = vcmask 506880   ;;  %vm651_vm9 = vcmask 269312   ;;  %vm668_vm10 = vcmask 252928   ;;  %vm686_vm11 = vcmask 236544  }
  0x1b   : > { %s189_s20 = scalar_lea.vmem %s182_s11, %s921_s8  ;;  %s1218_s8 = smov 64   ;;  %vm704_vm12 = vcmask 793600   ;;  %vm739_vm13 = vcmask 760832  }
  0x1c   : > { %v960_v0 = vld [vmem:[%s189_s20] sm:$0xf]  ;;  %v1018_v1 = vld [vmem:[%s189_s20 + $0x14] sm:$0xf0]  ;;  %v1016_v2 = vld [vmem:[%s189_s20 + $0x4] sm:$0xf] }
  0x1d   : > { %v961_v3 = vor.u32 %v1018_v1, %v960_v0  ;;  %v962_v4 = vld [vmem:[%s189_s20 + $0x18] sm:$0xf0]  ;;  %v968_v5 = vld [vmem:[%s189_s20 + $0x8] sm:$0xf]  ;;  %v1019_v6 = vld [vmem:[%s189_s20 + $0x1c] sm:$0xf0] }
  0x1e   : > { %v965_v7 = vor.u32 %v1016_v2, %v962_v4  ;;  %v969_v8 = vor.u32 %v1019_v6, %v968_v5  ;;  %v1017_v9 = vld [vmem:[%s189_s20 + $0xc] sm:$0xf]  ;;  %v970_v10 = vld [vmem:[%s189_s20 + $0x20] sm:$0xf0]  ;;  %s1221_s11 = smov 33   ;;  %s1222_s20 = smov 31  }
  0x1f   : > { %312 = vmatpush.bf16.msra.mxu0 %v961_v3  ;;  %v973_v12 = vor.u32 %v1017_v9, %v970_v10 }
  0x20   : > { %363 = vmatpush.bf16.msra.mxu1 %v965_v7  ;;  %417 = vmatpush.bf16.msra.mxu2 %v969_v8 }
  0x21   : > { %470 = vmatpush.bf16.msra.mxu3 %v973_v12 }
  0x22   : > { %974 = vmatmul.msk.bf16.vlgmr.msra.gmra.mxu0 %vm277_vm0, %v1020_v11 }
  0x23   : > { %983 = vmatmul.msk.bf16.vlgmr.msra.gmra.mxu1 %vm277_vm0, %v1020_v11  ;;  %992 = vmatmul.msk.bf16.vlgmr.msra.gmra.mxu2 %vm277_vm0, %v1020_v11 }
  0x24   : > { %1001 = vmatmul.msk.bf16.vlgmr.msra.gmra.mxu3 %vm277_vm0, %v1020_v11 }
  0x32   : > { %975 = vmatmul.msk.bf16.gmra.mxu0 %vm277_vm0, %v1021_v13 }
  0x33   : > { %984 = vmatmul.msk.bf16.gmra.mxu1 %vm277_vm0, %v1021_v13  ;;  %993 = vmatmul.msk.bf16.gmra.mxu2 %vm277_vm0, %v1021_v13 }
  0x34   : > { %1002 = vmatmul.msk.bf16.gmra.mxu3 %vm277_vm0, %v1021_v13 }
  0x42   : > { %976 = vmatmul.msk.bf16.gmra.mxu0 %vm277_vm0, %v1022_v14 }
  0x43   : > { %985 = vmatmul.msk.bf16.gmra.mxu1 %vm277_vm0, %v1022_v14  ;;  %994 = vmatmul.msk.bf16.gmra.mxu2 %vm277_vm0, %v1022_v14 }
  0x44   : > { %1003 = vmatmul.msk.bf16.gmra.mxu3 %vm277_vm0, %v1022_v14 }
  0x52   : > { %977 = vmatmul.msk.bf16.gmra.mxu0 %vm277_vm0, %v1023_v15 }
  0x53   : > { %986 = vmatmul.msk.bf16.gmra.mxu1 %vm277_vm0, %v1023_v15  ;;  %995 = vmatmul.msk.bf16.gmra.mxu2 %vm277_vm0, %v1023_v15 }
  0x54   : > { %1004 = vmatmul.msk.bf16.gmra.mxu3 %vm277_vm0, %v1023_v15 }
  0x62   : > { %978 = vmatmul.msk.bf16.gmra.mxu0 %vm277_vm0, %v1024_v16 }
  0x63   : > { %987 = vmatmul.msk.bf16.gmra.mxu1 %vm277_vm0, %v1024_v16  ;;  %996 = vmatmul.msk.bf16.gmra.mxu2 %vm277_vm0, %v1024_v16 }
  0x64   : > { %1005 = vmatmul.msk.bf16.gmra.mxu3 %vm277_vm0, %v1024_v16  ;;  %v1226_v16 = vmov 0  }
  0x65   : > { %1115 = vset.pattern.permute.xlu1 %v1226_v16  ;;  %1116 = vset.pattern.permute.xlu0 %v1226_v16 }
  0x72   : > { %979 = vmatmul.msk.bf16.gmra.mxu0 %vm277_vm0, %v1025_v17 }
  0x73   : > { %988 = vmatmul.msk.bf16.gmra.mxu1 %vm277_vm0, %v1025_v17  ;;  %997 = vmatmul.msk.bf16.gmra.mxu2 %vm277_vm0, %v1025_v17 }
  0x74   : > { %1006 = vmatmul.msk.bf16.gmra.mxu3 %vm277_vm0, %v1025_v17 }
  0x82   : > { %980 = vmatmul.msk.bf16.gmra.mxu0 %vm277_vm0, %v1026_v18 }
  0x83   : > { %989 = vmatmul.msk.bf16.gmra.mxu1 %vm277_vm0, %v1026_v18  ;;  %998 = vmatmul.msk.bf16.gmra.mxu2 %vm277_vm0, %v1026_v18 }
  0x84   : > { %1007 = vmatmul.msk.bf16.gmra.mxu3 %vm277_vm0, %v1026_v18 }
  0x92   : > { %981 = vmatmul.msk.bf16.gmra.mxu0 %vm277_vm0, %v1027_v19 }
  0x93   : > { %990 = vmatmul.msk.bf16.gmra.mxu1 %vm277_vm0, %v1027_v19  ;;  %999 = vmatmul.msk.bf16.gmra.mxu2 %vm277_vm0, %v1027_v19 }
  0x94   : > { %1008 = vmatmul.msk.bf16.gmra.mxu3 %vm277_vm0, %v1027_v19 }
  0x9f   : > { %v1380_v20 = vpop.f32.mrf.mxu0 }
  0xa0   : > { %v1385_v22 = vpop.f32.mrf.mxu1 }
  0xa2   : > { %982 = vmatmul.msk.bf16.gmra.mxu0 %vm277_vm0, %v1028_v21 }
  0xa3   : > { %991 = vmatmul.msk.bf16.gmra.mxu1 %vm277_vm0, %v1028_v21  ;;  %1000 = vmatmul.msk.bf16.gmra.mxu2 %vm277_vm0, %v1028_v21 }
  0xa4   : > { %1009 = vmatmul.msk.bf16.gmra.mxu3 %vm277_vm0, %v1028_v21 }
  0xa6   : > { %v1391_v23 = vpop.f32.mrf.mxu2 }
  0xa7   : > { %v472_v24 = vpop.f32.mrf.mxu3  ;;  %v316_v25 = vpop.f32.mrf.mxu0 }
  0xa8   : > { %v367_v26 = vpop.f32.mrf.mxu1  ;;  %504 = vrot.lane.b32.xlu0 %v316_v25, %s1213_s29 }
  0xae   : > { %v421_v27 = vpop.f32.mrf.mxu2 }
  0xaf   : > { %v473_v28 = vpop.f32.mrf.mxu3  ;;  %508 = vrot.lane.b32.xlu1 %v421_v27, %s1213_s29  ;;  %v319_v29 = vpop.f32.mrf.mxu0 }
  0xb0   : > { %v370_v30 = vpop.f32.mrf.mxu1  ;;  %506 = vrot.lane.b32.xlu0 %v367_v26, %s1213_s29 }
  0xb1   : > { %524 = vrot.lane.b32.xlu2 %v370_v30, %s1214_s4 }
  0xb6   : > { %v424_v31 = vpop.f32.mrf.mxu2 }
  0xb7   : > { %v475_v32 = vpop.f32.mrf.mxu3  ;;  %522 = vrot.lane.b32.xlu1 %v319_v29, %s1214_s4  ;;  %v321_v33 = vpop.f32.mrf.mxu0 }
  0xb8   : > { %v372_v34 = vpop.f32.mrf.mxu1  ;;  %540 = vrot.lane.b32.xlu0 %v321_v33, %s1215_s5 }
  0xb9   : > { %526 = vrot.lane.b32.xlu2 %v424_v31, %s1214_s4  ;;  %s1011_s4 = sshll.u32 %s1195_s15, 1 }
  0xbe   : > { %v426_v35 = vpop.f32.mrf.mxu2 }
  0xbf   : > { %v476_v36 = vpop.f32.mrf.mxu3  ;;  %542 = vrot.lane.b32.xlu1 %v372_v34, %s1215_s5  ;;  %v324_v37 = vpop.f32.mrf.mxu0 }
  0xc0   : > { %v375_v38 = vpop.f32.mrf.mxu1  ;;  %558 = vrot.lane.b32.xlu0 %v324_v37, %s1216_s6 }
  0xc1   : > { %544 = vrot.lane.b32.xlu2 %v426_v35, %s1215_s5  ;;  %s1012_s5 = sshll.u32 %s1199_s16, 2 }
  0xc6   : > { %v429_v39 = vpop.f32.mrf.mxu2 }
  0xc7   : > { %v478_v40 = vpop.f32.mrf.mxu3  ;;  %560 = vrot.lane.b32.xlu1 %v375_v38, %s1216_s6  ;;  %v326_v41 = vpop.f32.mrf.mxu0 }
  0xc8   : > { %v377_v42 = vpop.f32.mrf.mxu1  ;;  %576 = vrot.lane.b32.xlu0 %v326_v41, %s1217_s7 }
  0xc9   : > { %562 = vrot.lane.b32.xlu2 %v429_v39, %s1216_s6 }
  0xce   : > { %v431_v43 = vpop.f32.mrf.mxu2 }
  0xcf   : > { %v479_v44 = vpop.f32.mrf.mxu3  ;;  %578 = vrot.lane.b32.xlu1 %v377_v42, %s1217_s7  ;;  %v329_v45 = vpop.f32.mrf.mxu0 }
  0xd0   : > { %v380_v46 = vpop.f32.mrf.mxu1  ;;  %594 = vrot.lane.b32.xlu0 %v329_v45, %s1218_s8 }
  0xd1   : > { %580 = vrot.lane.b32.xlu2 %v431_v43, %s1217_s7  ;;  %s175_s7 = sand.u32 1, %s1187_s13  }
  0xd2   : > { %s820_s15 = scalar_lea.sflag [#allocation3], %s175_s7 }
  0xd6   : > { %v434_v47 = vpop.f32.mrf.mxu2 }
  0xd7   : > { %v481_v48 = vpop.f32.mrf.mxu3  ;;  %596 = vrot.lane.b32.xlu1 %v380_v46, %s1218_s8  ;;  %v331_v49 = vpop.f32.mrf.mxu0 }
  0xd8   : > { %v382_v50 = vpop.f32.mrf.mxu1  ;;  %612 = vrot.lane.b32.xlu0 %v331_v49, %s1219_s9 }
  0xd9   : > { %598 = vrot.lane.b32.xlu2 %v434_v47, %s1218_s8  ;;  %s831_s8 = sadd.s32 %s1012_s5, %s1011_s4  ;;  %s1137_s5 = scalar_lea.hbm %s1494_s3, 64 }
  0xde   : > { %v436_v51 = vpop.f32.mrf.mxu2 }
  0xdf   : > { %v482_v52 = vpop.f32.mrf.mxu3  ;;  %614 = vrot.lane.b32.xlu1 %v382_v50, %s1219_s9  ;;  %v334_v53 = vpop.f32.mrf.mxu0 }
  0xe0   : > { %v385_v54 = vpop.f32.mrf.mxu1  ;;  %630 = vrot.lane.b32.xlu0 %v334_v53, %s1220_s10  ;;  %v795_v52 = vld [vmem:[%s1493_s2] sm:$0xff] }
  0xe1   : > { %616 = vrot.lane.b32.xlu2 %v436_v51, %s1219_s9  ;;  %s918_s9 = sshll.u32 %s175_s7, 4 }
  0xe6   : > { %v439_v55 = vpop.f32.mrf.mxu2 }
  0xe7   : > { %v484_v56 = vpop.f32.mrf.mxu3  ;;  %632 = vrot.lane.b32.xlu1 %v385_v54, %s1220_s10  ;;  %v336_v57 = vpop.f32.mrf.mxu0 }
  0xe8   : > { %v387_v58 = vpop.f32.mrf.mxu1  ;;  %647 = vrot.lane.b32.xlu0 %v336_v57, %s1221_s11 }
  0xe9   : > { %634 = vrot.lane.b32.xlu2 %v439_v55, %s1220_s10  ;;  %s1013_s10 = sshll.u32 %s831_s8, 3 }
  0xee   : > { %v441_v59 = vpop.f32.mrf.mxu2 }
  0xef   : > { %v485_v60 = vpop.f32.mrf.mxu3  ;;  %649 = vrot.lane.b32.xlu1 %v387_v58, %s1221_s11  ;;  %v339_v61 = vpop.f32.mrf.mxu0 }
  0xf0   : > { %v390_v62 = vpop.f32.mrf.mxu1 }
  0xf1   : > { %662 = vrot.lane.b32.xlu2 %v339_v61, %s1222_s20  ;;  %664 = vrot.lane.b32.xlu0 %v390_v62, %s1222_s20 }
  0xf6   : > { %v443_v63 = vpop.f32.mrf.mxu2 }
  0xf7   : > { %v487_v0 = vpop.f32.mrf.mxu3  ;;  %666 = vrot.lane.b32.xlu1 %v443_v63, %s1222_s20  ;;  %v341_v1 = vpop.f32.mrf.mxu0 }
  0xf8   : > { %v392_v2 = vpop.f32.mrf.mxu1 }
  0xf9   : > { %680 = vrot.lane.b32.xlu2 %v341_v1, %s1223_s21  ;;  %682 = vrot.lane.b32.xlu0 %v392_v2, %s1223_s21 }
  0xfe   : > { %v445_v3 = vpop.f32.mrf.mxu2 }
  0xff   : > { %v488_v4 = vpop.f32.mrf.mxu3  ;;  %684 = vrot.lane.b32.xlu1 %v445_v3, %s1223_s21  ;;  %v344_v5 = vpop.f32.mrf.mxu0 }
 0x100   : > { %v395_v6 = vpop.f32.mrf.mxu1 }
 0x101   : > { %698 = vrot.lane.b32.xlu2 %v344_v5, %s1224_s24  ;;  %700 = vrot.lane.b32.xlu0 %v395_v6, %s1224_s24 }
 0x106   : > { %v448_v7 = vpop.f32.mrf.mxu2 }
 0x107   : > { %v490_v8 = vpop.f32.mrf.mxu3  ;;  %702 = vrot.lane.b32.xlu1 %v448_v7, %s1224_s24  ;;  %v346_v9 = vpop.f32.mrf.mxu0  ;;  %s177_s24 = scalar_lea.vmem [#allocation2], %s918_s9 }
 0x108   : > { %v397_v10 = vpop.f32.mrf.mxu1 }
 0x109   : > { %716 = vrot.lane.b32.xlu2 %v346_v9, %s1216_s6  ;;  %718 = vrot.lane.b32.xlu0 %v397_v10, %s1216_s6 }
 0x10b   : > { %v525_v11 = vpop.permute.xlu2 %524 }
 0x10e   : > { %v450_v12 = vpop.f32.mrf.mxu2 }
 0x10f   : > { %v491_v13 = vpop.f32.mrf.mxu3  ;;  %720 = vrot.lane.b32.xlu1 %v450_v12, %s1216_s6  ;;  %v349_v14 = vpop.f32.mrf.mxu0 }
 0x110   : > { %v400_v15 = vpop.f32.mrf.mxu1 }
 0x111   : > { %733 = vrot.lane.b32.xlu2 %v349_v14, %s1225_s27  ;;  %735 = vrot.lane.b32.xlu0 %v400_v15, %s1225_s27 }
 0x113   : > { %v527_v17 = vpop.permute.xlu2 %526 }
 0x114   : > { %v530_v18 = vsel %vm528_vm1, %v525_v11, %v527_v17 }
 0x116   : > { %v453_v19 = vpop.f32.mrf.mxu2 }
 0x117   : > { %v493_v21 = vpop.f32.mrf.mxu3  ;;  %737 = vrot.lane.b32.xlu1 %v453_v19, %s1225_s27  ;;  %v351_v24 = vpop.f32.mrf.mxu0  ;;  %s835_s27 = sshll.u32 %s177_s24, 4  ;;  %s836_s27 = int_to_ptr.vmem [resolvable:$true] %s835_s27 }
 0x118   : > { %v402_v25 = vpop.f32.mrf.mxu1 }
 0x119   : > { %750 = vrot.lane.b32.xlu2 %v402_v25, %s1221_s11 }
 0x11a   : > { %v505_v26 = vpop.permute.xlu0 %504 }
 0x11b   : > { %v545_v27 = vpop.permute.xlu2 %544 }
 0x11e   : > { %v455_v28 = vpop.f32.mrf.mxu2 }
 0x11f   : > { %v494_v29 = vpop.f32.mrf.mxu3  ;;  %752 = vrot.lane.b32.xlu0 %v455_v28, %s1221_s11  ;;  %v353_v30 = vpop.f32.mrf.mxu0 }
 0x120   : > { %v405_v31 = vpop.f32.mrf.mxu1 }
 0x121   : > { %v509_v32 = vpop.permute.xlu1 %508  ;;  %764 = vrot.lane.b32.xlu1 %v405_v31, %s1222_s20 }
 0x122   : > { %v518_v33 = vadd.f32 %v509_v32, %v1391_v23  ;;  %v507_v34 = vpop.permute.xlu0 %506 }
 0x123   : > { %v511_v35 = vsel %vm510_vm2, %v505_v26, %v507_v34  ;;  %v512_v36 = vsel %vm510_vm2, %v507_v34, %v509_v32  ;;  %v563_v37 = vpop.permute.xlu2 %562 }
 0x124   : > { %v536_v38 = vadd.f32 %v527_v17, %v518_v33  ;;  %v517_v39 = vadd.f32 %v512_v36, %v1385_v22  ;;  %v516_v23 = vadd.f32 %v511_v35, %v1380_v20 }
 0x126   : > { %v554_v40 = vadd.f32 %v545_v27, %v536_v38  ;;  %v535_v41 = vadd.f32 %v530_v18, %v517_v39  ;;  %v458_v42 = vpop.f32.mrf.mxu2 }
 0x127   : > { %v496_v43 = vpop.f32.mrf.mxu3  ;;  %766 = vrot.lane.b32.xlu2 %v458_v42, %s1222_s20  ;;  %v354_v44 = vpop.f32.mrf.mxu0 }
 0x128   : > { %v572_v45 = vadd.f32 %v563_v37, %v554_v40  ;;  %768 = vrot.lane.b32.xlu0 %v496_v43, %s1222_s20  ;;  %v407_v46 = vpop.f32.mrf.mxu1 }
 0x129   : > { %v523_v47 = vpop.permute.xlu1 %522  ;;  %781 = vrot.lane.b32.xlu1 %v407_v46, %s1223_s21 }
 0x12a   : > { %v529_v48 = vsel %vm528_vm1, %v523_v47, %v525_v11  ;;  %v541_v49 = vpop.permute.xlu0 %540 }
 0x12b   : > { %v534_v22 = vadd.f32 %v529_v48, %v516_v23  ;;  %v581_v50 = vpop.permute.xlu2 %580 }
 0x12c   : > { %v1418_v51 = vadd.f32 %v581_v50, %v572_v45 }
 0x12e   : > { %v460_v53 = vpop.f32.mrf.mxu2 }
 0x12f   : > { %v498_v54 = vpop.f32.mrf.mxu3  ;;  %783 = vrot.lane.b32.xlu2 %v460_v53, %s1223_s21 }
 0x130   : > { %785 = vrot.lane.b32.xlu0 %v498_v54, %s1223_s21  ;;  %s833_s21 = scalar_lea.hbm %s1494_s3, %s1013_s10 }
 0x131   : > { %v543_v20 = vpop.permute.xlu1 %542  ;;  %798 = vperm.xlu1 %1115, %v795_v52   ;;  %s837_s28 = sshll.u32 %s833_s21, 4  ;;  %s838_s28 = int_to_ptr.hbm [resolvable:$true] %s837_s28 }
 0x132   : > { %v547_v55 = vsel %vm546_vm3, %v541_v49, %v543_v20  ;;  %v548_v56 = vsel %vm546_vm3, %v543_v20, %v545_v27  ;;  %v559_v57 = vpop.permute.xlu0 %558  ;;  %s1131_s16 = sshra.s32 %s838_s28, 4  ;;  %s1132_s16 = int_to_ptr.hbm [resolvable:$true] %s1131_s16 }
 0x133   : > { %v552_v58 = vadd.f32 %v547_v55, %v534_v22  ;;  %v553_v59 = vadd.f32 %v548_v56, %v535_v41  ;;  %v599_v2 = vpop.permute.xlu2 %598  ;;  %p1138_p2 = scmp.lt.s32.totalorder %s1132_s16, %s1494_s3 }
 0x134   : > { %v608_v22 = vadd.f32 %v599_v2, %v1418_v51 }
 0x139   : > { %v561_v60 = vpop.permute.xlu1 %560 }
 0x13a   : > { %v565_v61 = vsel %vm564_vm4, %v559_v57, %v561_v60  ;;  %v566_v62 = vsel %vm564_vm4, %v561_v60, %v563_v37  ;;  %v577_v63 = vpop.permute.xlu0 %576 }
 0x13b   : > { %v570_v0 = vadd.f32 %v565_v61, %v552_v58  ;;  %v571_v1 = vadd.f32 %v566_v62, %v553_v59  ;;  %v617_v9 = vpop.permute.xlu2 %616 }
 0x13c   : > { %v626_v53 = vadd.f32 %v617_v9, %v608_v22 }
 0x141   : > { %v579_v3 = vpop.permute.xlu1 %578 }
 0x142   : > { %v583_v4 = vsel %vm582_vm5, %v577_v63, %v579_v3  ;;  %v584_v5 = vsel %vm582_vm5, %v579_v3, %v581_v50  ;;  %v595_v6 = vpop.permute.xlu0 %594 }
 0x143   : > { %v588_v7 = vadd.f32 %v583_v4, %v570_v0  ;;  %v589_v8 = vadd.f32 %v584_v5, %v571_v1  ;;  %v635_v14 = vpop.permute.xlu2 %634 }
 0x144   : > { %v644_v56 = vadd.f32 %v635_v14, %v626_v53 }
 0x149   : > { %v597_v10 = vpop.permute.xlu1 %596 }
 0x14a   : > { %v601_v11 = vsel %vm600_vm6, %v595_v6, %v597_v10  ;;  %v613_v12 = vpop.permute.xlu0 %612  ;;  %v602_v37 = vsel %vm600_vm6, %v597_v10, %v599_v2 }
 0x14b   : > { %v606_v13 = vadd.f32 %v601_v11, %v588_v7  ;;  %v663_v18 = vpop.permute.xlu2 %662  ;;  %v607_v41 = vadd.f32 %v602_v37, %v589_v8 }
 0x151   : > { %v615_v15 = vpop.permute.xlu1 %614 }
 0x152   : > { %v631_v16 = vpop.permute.xlu0 %630  ;;  %v619_v36 = vsel %vm618_vm7, %v613_v12, %v615_v15  ;;  %v620_v40 = vsel %vm618_vm7, %v615_v15, %v617_v9 }
 0x153   : > { %v681_v25 = vpop.permute.xlu2 %680  ;;  %v624_v39 = vadd.f32 %v619_v36, %v606_v13  ;;  %v625_v45 = vadd.f32 %v620_v40, %v607_v41 }
 0x159   : > { %v633_v17 = vpop.permute.xlu1 %632 }
 0x15a   : > { %v648_v19 = vpop.permute.xlu0 %647  ;;  %v637_v38 = vsel %vm636_vm8, %v631_v16, %v633_v17  ;;  %v638_v43 = vsel %vm636_vm8, %v633_v17, %v635_v14 }
 0x15b   : > { %v699_v28 = vpop.permute.xlu2 %698  ;;  %v642_v42 = vadd.f32 %v637_v38, %v624_v39  ;;  %v643_v47 = vadd.f32 %v638_v43, %v625_v45 }
 0x15d   : > { %v656_v48 = vadd.f32 %v648_v19, %v642_v42 }
 0x15f   : > { %v674_v54 = vadd.f32 %v663_v18, %v656_v48 }
 0x161   : > { %v650_v21 = vpop.permute.xlu1 %649  ;;  %v692_v51 = vadd.f32 %v681_v25, %v674_v54 }
 0x162   : > { %v652_v46 = vsel %vm651_vm9, %v648_v19, %v650_v21  ;;  %v658_v62 = vadd.f32 %v650_v21, %v644_v56 }
 0x163   : > { %v665_v24 = vpop.permute.xlu0 %664  ;;  %v717_v31 = vpop.permute.xlu2 %716  ;;  %v657_v50 = vadd.f32 %v652_v46, %v643_v47 }
 0x164   : > { %v669_v52 = vsel %vm668_vm10, %v663_v18, %v665_v24 }
 0x165   : > { %v675_v57 = vadd.f32 %v669_v52, %v657_v50 }
 0x169   : > { %v667_v26 = vpop.permute.xlu1 %666 }
 0x16a   : > { %v670_v58 = vsel %vm668_vm10, %v665_v24, %v667_v26 }
 0x16b   : > { %v683_v27 = vpop.permute.xlu0 %682  ;;  %v734_v35 = vpop.permute.xlu2 %733  ;;  %v676_v4 = vadd.f32 %v670_v58, %v658_v62 }
 0x16c   : > { %v687_v20 = vsel %vm686_vm11, %v681_v25, %v683_v27 }
 0x16d   : > { %v693_v63 = vadd.f32 %v687_v20, %v675_v57 }
 0x171   : > { %v685_v29 = vpop.permute.xlu1 %684 }
 0x172   : > { %v688_v1 = vsel %vm686_vm11, %v683_v27, %v685_v29 }
 0x173   : > { %v701_v30 = vpop.permute.xlu0 %700  ;;  %v751_v49 = vpop.permute.xlu2 %750  ;;  %v694_v9 = vadd.f32 %v688_v1, %v676_v4 }
 0x174   : > { %v705_v59 = vsel %vm704_vm12, %v699_v28, %v701_v30 }
 0x175   : > { %v710_v5 = vadd.f32 %v705_v59, %v692_v51 }
 0x179   : > { %v703_v32 = vpop.permute.xlu1 %702 }
 0x17a   : > { %v706_v60 = vsel %vm704_vm12, %v701_v30, %v703_v32  ;;  %v712_v13 = vadd.f32 %v703_v32, %v694_v9 }
 0x17b   : > { %v719_v33 = vpop.permute.xlu0 %718  ;;  %v711_v6 = vadd.f32 %v706_v60, %v693_v63 }
 0x17c   : > { %v722_v2 = vsel %vm564_vm4, %v717_v31, %v719_v33 }
 0x17d   : > { %v727_v10 = vadd.f32 %v722_v2, %v710_v5 }
 0x181   : > { %v721_v34 = vpop.permute.xlu1 %720  ;;  %v767_v0 = vpop.permute.xlu2 %766 }
 0x182   : > { %v723_v3 = vsel %vm564_vm4, %v719_v33, %v721_v34  ;;  %v729_v18 = vadd.f32 %v721_v34, %v712_v13 }
 0x183   : > { %v736_v44 = vpop.permute.xlu0 %735  ;;  %v728_v11 = vadd.f32 %v723_v3, %v711_v6 }
 0x184   : > { %v740_v7 = vsel %vm739_vm13, %v734_v35, %v736_v44 }
 0x185   : > { %v745_v14 = vadd.f32 %v740_v7, %v727_v10 }
 0x187   : > { %v758_v25 = vadd.f32 %v751_v49, %v745_v14 }
 0x189   : > { %v738_v23 = vpop.permute.xlu1 %737  ;;  %v784_v26 = vpop.permute.xlu2 %783 }
 0x18a   : > { %v741_v8 = vsel %vm739_vm13, %v736_v44, %v738_v23  ;;  %v747_v24 = vadd.f32 %v738_v23, %v729_v18 }
 0x18b   : > { %v746_v15 = vadd.f32 %v741_v8, %v728_v11 }
 0x191   : > { %v753_v55 = vpop.permute.xlu0 %752 }
 0x192   : > { %v754_v12 = vsel %vm651_vm9, %v751_v49, %v753_v55  ;;  %v760_v29 = vadd.f32 %v753_v55, %v747_v24 }
 0x193   : > { %v765_v61 = vpop.permute.xlu1 %764  ;;  %v759_v19 = vadd.f32 %v754_v12, %v746_v15 }
 0x194   : > { %v770_v21 = vsel %vm668_vm10, %v765_v61, %v767_v0  ;;  %v775_v30 = vadd.f32 %v765_v61, %v758_v25 }
 0x195   : > { %v776_v31 = vadd.f32 %v770_v21, %v759_v19 }
 0x19a   : > { %v769_v16 = vpop.permute.xlu0 %768 }
 0x19b   : > { %v782_v17 = vpop.permute.xlu1 %781  ;;  %v771_v27 = vsel %vm668_vm10, %v767_v0, %v769_v16 }
 0x19c   : > { %v787_v28 = vsel %vm686_vm11, %v782_v17, %v784_v26  ;;  %v777_v32 = vadd.f32 %v771_v27, %v760_v29  ;;  %v792_v33 = vadd.f32 %v782_v17, %v775_v30 }
 0x19d   : > { %v793_v35 = vadd.f32 %v787_v28, %v776_v31 }
 0x1a2   : > { %v786_v34 = vpop.permute.xlu0 %785 }
 0x1a3   : > { %v788_v36 = vsel %vm686_vm11, %v784_v26, %v786_v34  ;;  %v799_v37 = vpop.permute.xlu1 %798 }
 0x1a4   : > { %v794_v38 = vadd.f32 %v788_v36, %v777_v32  ;;  %v801_v39 = vadd.f32 %v799_v37, %v792_v33  ;;  %v802_v40 = vadd.f32 %v799_v37, %v793_v35 }
 0x1a6   : > { %v803_v41 = vadd.f32 %v799_v37, %v794_v38  ;;  %809 = vrot.lane.b32.xlu0 %v802_v40, %s1216_s6  ;;  %807 = vrot.lane.b32.xlu2 %v801_v39, %s1216_s6 }
 0x1a8   : > { %811 = vrot.lane.b32.xlu1 %v803_v41, %s1216_s6  ;;  %s1133_s6 = scalar_lea.hbm %s1132_s16, 16 }
 0x1a9   : > { %p1134_p13 = scmp.ne.s32.totalorder %s1132_s16, %s1133_s6  ;;  %p1139_p4 = scmp.lt.s32.totalorder %s1137_s5, %s1133_s6 }
 0x1ab   : > { %p1135_p0 = pnand %p1134_p13, %p1298_p3  ;;  %p1140_p5 = por %p1139_p4, %p1138_p2 }
 0x1ad   : > { %p1136_p1 = pneg %p1135_p0 }
 0x1af   : > { %p1141_p6 = pnand %p1140_p5, %p1136_p1 }
 0x200   : > { %v808_v42 = vpop.permute.xlu2 %807 }
 0x218   : > { %v810_v43 = vpop.permute.xlu0 %809 }
 0x219   : > { %v813_v44 = vsel %vm564_vm4, %v808_v42, %v810_v43 }
 0x21a   : > { %817 = vst [vmem:[%s177_s24] sm:$0xff] %v813_v44  ;;  %v812_v45 = vpop.permute.xlu1 %811 }
 0x21b   : > { %v814_v46 = vsel %vm564_vm4, %v810_v43, %v812_v45 }
 0x21c   : > { %818 = vst [vmem:[%s177_s24 + $0x8] sm:$0xff] %v814_v46 }
 0x21d   : > { %1144 = shalt.err (!%p1141_p6)
}
 0x21e   : > { %1030 = dma.vmem_to_hbm [thread:$0]  (%p1298_p3), %s836_s27, 256, %s838_s28, %s820_s15  }
 0x21f PF: > { %p1036_p7 = scmp.ge.s32.totalorder %s1211_s19, 2  ;;  %s849_s7 = sand.u32 1, %s1183_s12  }
 0x220   : > { %s850_s10 = scalar_lea.sflag [#allocation3], %s849_s7 }
 0x221   : > { %p1033_p9 = pnand %p1036_p7, %p1307_p8 }
 0x223   : > { %p1034_p10 = pneg %p1033_p9 }
 0x225   : > { %1178 = dma.done.wait (%p1034_p10), %s850_s10, 256  }
 0x226   : > { %1180 = vsyncadd (%p1034_p10), %s850_s10, 4294967040  ;;  %s16_s19 = sadd.s32 1, %s1211_s19   ;;  %s1497_s12 = smov %s1187_s13 }
 0x227   : > { %p13_p11 = scmp.ge.s32.totalorder %s16_s19, 6   ;;  %s1498_s13 = smov %s1191_s14 }
 0x228   : > { %s1499_s14 = smov %s1316_s30  ;;  %s1500_s15 = smov %s1203_s17 }
 0x229   : > { %s1501_s16 = smov %s1207_s18  ;;  %s1502_s17 = smov %s1505_s22 }
 0x22a   : > { %s1503_s18 = smov %s1509_s23  ;;  %15 = sbr.rel (!%p13_p11) target bundleno = 5 (0x5), region = 68 }
 0x22f   :  { %856 = vsyncpa [#allocation3], 1 }
 0x230   :  { %858 = vsyncpa [#allocation3 + $0x1], 1 }

</bundles_post_ra>
